<compile_context>
chip_gen: v7x
topology: tpu7x:2x2x1
jax: 0.10.0
libtpu: 0.0.40
codegen_flags: <defaults>
</compile_context>

<pallas_src>
import functools

import jax
import jax.numpy as jnp
from jax import lax
from jax.experimental import pallas as pl
from jax.experimental.pallas import tpu as pltpu

KH = KW = 3
GEM_P = 3.0
EPS = 1e-6
LANE = 128


def _round_up(x, m):
  return (x + m - 1) // m * m


def _l2n_rows(x):
  """L2N over the last axis: x / (||x||_2 + eps).

  Approximate reciprocal on the EUP slot + one Newton step on the VPU keeps
  the result effectively f32-exact while leaving the divide off the VALU.
  """
  norm = jnp.sqrt(jnp.sum(x * x, axis=-1, keepdims=True)) + EPS
  inv = pl.reciprocal(norm, approx=True)
  inv = inv * (2.0 - norm * inv)          # one Newton-Raphson refinement
  return x * inv


def _backbone_gem_kernel(patch_ref, wconv_ref, bconv_ref, out_ref, acc_ref, *,
                         cout, hw, strip, masked):
  """Grid = (batch tiles, HW strips). One step = conv + GeM partial for a strip.

  patch_ref: (B, STRIP, K9)    im2col rows of this strip for all B images
  wconv_ref: (K9, Cout_pad)    conv weights, lane-padded Cout
  bconv_ref: (1, Cout_pad)
  out_ref  : (B, Cout_pad)     L2N(GeM-pooled) descriptors (written on last strip)
  acc_ref  : (B, Cout_pad) f32 running per-image sum of clamp(feat, eps)^3
  """
  k = pl.program_id(1)

  @pl.when(k == 0)
  def _():
    acc_ref[...] = jnp.zeros_like(acc_ref)

  b, s, k9 = patch_ref.shape
  # --- 3x3 conv over this strip as ONE im2col matmul (MXU, f32 acc). ---
  feat = jnp.dot(patch_ref[...].reshape(b * s, k9), wconv_ref[...],
                 preferred_element_type=jnp.float32)
  # Fused ReLU + GeM eps clamp (EPS > 0 => identical to relu-then-clamp).
  c = jnp.maximum(feat + bconv_ref[...], EPS)
  cubed = (c * c * c).reshape(b, s, -1)        # x**p, p=3, on the VPU (no EUP)
  if masked:
    # Zero contributions from HW-padding rows (only when HW % strip != 0).
    row = lax.broadcasted_iota(jnp.int32, cubed.shape, 1) + k * strip
    cubed = jnp.where(row < hw, cubed, 0.0)
  # Per-image partial sum over the strip's spatial positions (XLU reduce).
  acc_ref[...] += jnp.sum(cubed, axis=1)

  @pl.when(k == pl.num_programs(1) - 1)
  def _():
    pooled = (acc_ref[...] * (1.0 / hw)) ** (1.0 / GEM_P)     # GeM mean + root
    lane_idx = lax.broadcasted_iota(jnp.int32, pooled.shape, 1)
    pooled = jnp.where(lane_idx < cout, pooled, 0.0)          # kill lane padding
    out_ref[...] = _l2n_rows(pooled)                          # first L2N


def _whiten_kernel(pooled_ref, wwhit_ref, bwhit_ref, out_ref):
  """Whitening Linear + second L2N over a tile of rows of the full batch.

  pooled_ref: (TM, Cout_pad)   L2-normalized GeM descriptors
  wwhit_ref : (Cout_pad, D_pad)
  bwhit_ref : (1, D_pad)
  out_ref   : (TM, D_pad)
  """
  wh = jnp.dot(pooled_ref[...], wwhit_ref[...],
               preferred_element_type=jnp.float32) + bwhit_ref[...]
  out_ref[...] = _l2n_rows(wh)


@functools.partial(jax.jit, static_argnames=("ps", "block_n", "strip_hw",
                                             "matmul_dtype", "patch_buffers"))
def image_retrieval_net(x_nchw, wconv_oihw, bconv, wwhit_do, bwhit, ps=1,
                        block_n=8, strip_hw=1024, matmul_dtype=jnp.bfloat16,
                        patch_buffers=None):
  """Pallas-backed forward of ImageRetrievalNet (non-flexivit conv branch)."""
  # TODO(synk): the flexivit branch (patch-size-dependent ViT backbone) has no
  # Pallas equivalent here; `ps` is accepted for API parity and ignored.
  del ps

  N, Cin, H, W = x_nchw.shape
  Cout = wconv_oihw.shape[0]
  D = wwhit_do.shape[0]
  HW = H * W
  K9 = KH * KW * Cin
  Cout_pad = _round_up(Cout, LANE)
  D_pad = _round_up(D, LANE)

  # Batch tiling: B images per grid step. On v7x keep NB >= 2 so both
  # TensorCores get work (shrink B rather than collapsing to one grid step).
  B = min(block_n, N)
  NB = pl.cdiv(N, B)
  N_pad = NB * B

  # Strip tiling of the H*W rows (running GeM partial sum in VMEM scratch).
  strip = min(strip_hw, HW)
  if strip < HW:
    strip = max(8, strip // 8 * 8)
  KS = pl.cdiv(HW, strip)
  HW_pad = KS * strip
  masked = HW_pad != HW

  # ---- glue: layout conversion + im2col, done in matmul_dtype (bf16 default:
  # halves the 9x-inflated HBM write+read of the im2col materialization). ----
  # TODO(synk): at real retrieval resolutions on v5e, build the 9 taps in VMEM
  # from a DMA'd padded-NHWC row strip instead of materializing 9x patches in
  # HBM (cuts conv-stage HBM traffic up to ~9x on the bandwidth-starved gen).
  x_nhwc = jnp.transpose(x_nchw, (0, 2, 3, 1)).astype(matmul_dtype)
  xpad = jnp.pad(x_nhwc, ((0, 0), (1, 1), (1, 1), (0, 0)))
  taps = [xpad[:, ky:ky + H, kx:kx + W, :]
          for ky in range(KH) for kx in range(KW)]
  patches = jnp.concatenate(taps, axis=-1).reshape(N, HW, K9)
  patches = jnp.pad(patches, ((0, N_pad - N), (0, HW_pad - HW), (0, 0)))
  patches = patches.reshape(NB, B, HW_pad, K9)

  wconv = jnp.transpose(wconv_oihw, (2, 3, 1, 0)).reshape(K9, Cout)
  wconv = jnp.pad(wconv, ((0, 0), (0, Cout_pad - Cout))).astype(matmul_dtype)
  bconv2 = jnp.pad(bconv, (0, Cout_pad - Cout)).reshape(1, Cout_pad)
  bconv2 = bconv2.astype(jnp.float32)

  # Explicit VMEM budget: double-buffered patch strip + resident weights +
  # f32 intermediates. On v7x (64 MiB physical) halve strip_hw and re-check.
  item = jnp.dtype(matmul_dtype).itemsize
  vmem_est = (2 * B * strip * K9 * item                  # patch strip, 2 bufs
              + 2 * (K9 * Cout_pad * item + Cout_pad * 4)
              + 3 * B * strip * Cout_pad * 4             # feat / c / c^3
              + 3 * B * Cout_pad * 4)                    # out (2 bufs) + acc
  vmem_limit = int(min(max(2 * vmem_est, 32 << 20), 112 << 20))

  patch_spec_kwargs = {}
  if patch_buffers is not None:   # deepen only if xprof shows exposed patch DMA
    patch_spec_kwargs["pipeline_mode"] = pl.Buffered(patch_buffers)

  gem_kernel = functools.partial(_backbone_gem_kernel, cout=Cout, hw=HW,
                                 strip=strip, masked=masked)

  pooled = pl.pallas_call(
      gem_kernel,
      out_shape=jax.ShapeDtypeStruct((NB, B, Cout_pad), jnp.float32),
      grid_spec=pltpu.PrefetchScalarGridSpec(
          num_scalar_prefetch=0,
          grid=(NB, KS),
          in_specs=[
              pl.BlockSpec((pl.Squeezed(), B, strip, K9),
                           lambda n, k: (n, 0, k, 0), **patch_spec_kwargs),
              pl.BlockSpec((K9, Cout_pad), lambda n, k: (0, 0)),
              pl.BlockSpec((1, Cout_pad), lambda n, k: (0, 0)),
          ],
          out_specs=pl.BlockSpec((pl.Squeezed(), B, Cout_pad),
                                 lambda n, k: (n, 0, 0)),
          scratch_shapes=[pltpu.VMEM((B, Cout_pad), jnp.float32)]),
      compiler_params=pltpu.CompilerParams(
          dimension_semantics=("parallel", "arbitrary"),
          vmem_limit_bytes=vmem_limit),
  )(patches, wconv, bconv2)

  # ---- whitening + second L2N as a separate small Pallas GEMM over the FULL
  # batch (M = N, not M = B), keeping wwhit out of the conv kernel's VMEM. ----
  pooled = pooled.reshape(N_pad, Cout_pad)[:N]
  TM = min(256, _round_up(N, 8))
  N_pad2 = _round_up(N, TM)
  pooled = jnp.pad(pooled, ((0, N_pad2 - N), (0, 0))).astype(matmul_dtype)

  wwhit = jnp.transpose(wwhit_do, (1, 0))                      # (Cout, D)
  wwhit = jnp.pad(wwhit, ((0, Cout_pad - Cout), (0, D_pad - D)))
  wwhit = wwhit.astype(matmul_dtype)
  bwhit2 = jnp.pad(bwhit, (0, D_pad - D)).reshape(1, D_pad).astype(jnp.float32)

  wh = pl.pallas_call(
      _whiten_kernel,
      out_shape=jax.ShapeDtypeStruct((N_pad2, D_pad), jnp.float32),
      grid_spec=pltpu.PrefetchScalarGridSpec(
          num_scalar_prefetch=0,
          grid=(N_pad2 // TM,),
          in_specs=[
              pl.BlockSpec((TM, Cout_pad), lambda i: (i, 0)),
              pl.BlockSpec((Cout_pad, D_pad), lambda i: (0, 0)),
              pl.BlockSpec((1, D_pad), lambda i: (0, 0)),
          ],
          out_specs=pl.BlockSpec((TM, D_pad), lambda i: (i, 0))),
      compiler_params=pltpu.CompilerParams(
          dimension_semantics=("parallel",)),
  )(pooled, wwhit, bwhit2)

  o = wh[:N, :D]                           # drop batch + lane padding
  return jnp.transpose(o, (1, 0))          # o.permute(1, 0) -> (D, N)


def _reference(x_nchw, wconv_oihw, bconv, wwhit_do, bwhit):
  """Pure-JAX reference matching the PyTorch semantics."""
  o = lax.conv_general_dilated(
      x_nchw, wconv_oihw, window_strides=(1, 1), padding=((1, 1), (1, 1)),
      dimension_numbers=("NCHW", "OIHW", "NCHW"))
  o = jnp.maximum(o + bconv[None, :, None, None], 0.0)
  pooled = jnp.mean(jnp.maximum(o, EPS) ** GEM_P, axis=(2, 3)) ** (1.0 / GEM_P)
  pooled = pooled / (jnp.linalg.norm(pooled, axis=1, keepdims=True) + EPS)
  wh = pooled @ wwhit_do.T + bwhit
  wh = wh / (jnp.linalg.norm(wh, axis=1, keepdims=True) + EPS)
  return wh.T  # (D, N)


if __name__ == "__main__":
  # Small, module-consistent shapes.
  N, Cin, H, W = 2, 4, 16, 16
  Cout, D = 32, 16

  meta = dict(architecture="resnet-synthetic", pooling="gem", whitening=True,
              outputdim=D, mean=[0.485, 0.456, 0.406], std=[0.229, 0.224, 0.225])

  key = jax.random.PRNGKey(0)
  kx, kw, kb, kww, kwb = jax.random.split(key, 5)
  x = jax.random.normal(kx, (N, Cin, H, W), jnp.float32)
  w_conv = jax.random.normal(kw, (Cout, Cin, KH, KW), jnp.float32) * 0.1  # OIHW
  b_conv = jax.random.normal(kb, (Cout,), jnp.float32) * 0.1
  w_whit = jax.random.normal(kww, (D, Cout), jnp.float32) * 0.1           # (out, in)
  b_whit = jax.random.normal(kwb, (D,), jnp.float32) * 0.1

  ref = _reference(x, w_conv, b_conv, w_whit, b_whit)

  # f32 MXU inputs with a strip that does NOT divide H*W (exercises the
  # HW-padding row mask and the 3-strip accumulator path): tight check.
  out_f32 = image_retrieval_net(x, w_conv, b_conv, w_whit, b_whit, ps=1,
                                strip_hw=96, matmul_dtype=jnp.float32)
  out_f32 = jax.block_until_ready(out_f32)
  assert out_f32.shape == (D, N), out_f32.shape
  assert jnp.allclose(out_f32, ref, rtol=1e-3, atol=1e-3), \
      float(jnp.max(jnp.abs(out_f32 - ref)))

  # Default bf16 MXU inputs (production throughput path), 2 strips: looser check.
  out_bf16 = image_retrieval_net(x, w_conv, b_conv, w_whit, b_whit, ps=1,
                                 strip_hw=128)
  out_bf16 = jax.block_until_ready(out_bf16)
  assert out_bf16.shape == (D, N), out_bf16.shape
  assert jnp.allclose(out_bf16, ref, rtol=3e-2, atol=3e-2), \
      float(jnp.max(jnp.abs(out_bf16 - ref)))

  print("KERNEL_OK")
</pallas_src>

<mosaic_0001>
module attributes {stable_mosaic.version = 11 : i64} {
  func.func @_backbone_gem_kernel(%arg0: i32, %arg1: i32, %arg2: memref<1x2x96x36xf32, #tpu.memory_space<vmem>>, %arg3: memref<36x128xf32, #tpu.memory_space<vmem>>, %arg4: memref<1x128xf32, #tpu.memory_space<vmem>>, %arg5: memref<1x2x128xf32, #tpu.memory_space<vmem>>, %arg6: memref<2x128xf32, #tpu.memory_space<vmem>>) attributes {dimension_semantics = [#tpu.dimension_semantics<parallel>, #tpu.dimension_semantics<arbitrary>], iteration_bounds = array<i64: 1, 3>, scalar_prefetch = 0 : i64, scratch_operands = 1 : i64, tpu.core_type = #tpu.core_type<tc>, window_params = [{transform_indices = @transform_0, window_bounds = array<i64: 1, 2, 96, 36>}, {pipeline_mode = #tpu.pipeline_mode<synchronous>, transform_indices = @transform_1, window_bounds = array<i64: 36, 128>}, {pipeline_mode = #tpu.pipeline_mode<synchronous>, transform_indices = @transform_2, window_bounds = array<i64: 1, 128>}, {transform_indices = @transform_3, window_bounds = array<i64: 1, 2, 128>}]} {
    %c0_i32 = arith.constant 0 : i32
    %0 = arith.cmpi eq, %arg1, %c0_i32 : i32
    %1 = arith.extui %0 : i1 to i32
    %c0_i32_0 = arith.constant 0 : i32
    %2 = arith.cmpi ne, %1, %c0_i32_0 : i32
    scf.if %2 {
      %cst_16 = arith.constant 0.000000e+00 : f32
      %31 = vector.broadcast %cst_16 : f32 to vector<2x128xf32>
      %c0_17 = arith.constant 0 : index
      %c0_18 = arith.constant 0 : index
      %32 = vector.load %arg6[%c0_17, %c0_18] : memref<2x128xf32, #tpu.memory_space<vmem>>, vector<2x128xf32>
      tpu.vector_store %arg6[%c0_17, %c0_18], %31 {strides = array<i32>} : memref<2x128xf32, #tpu.memory_space<vmem>>, vector<2x128xf32>,
    } else {
    }
    %c0 = arith.constant 0 : index
    %c0_1 = arith.constant 0 : index
    %c0_2 = arith.constant 0 : index
    %c0_3 = arith.constant 0 : index
    %3 = vector.load %arg2[%c0, %c0_1, %c0_2, %c0_3] : memref<1x2x96x36xf32, #tpu.memory_space<vmem>>, vector<1x2x96x36xf32>
    %4 = vector.shape_cast %3 : vector<1x2x96x36xf32> to vector<2x96x36xf32>
    %5 = vector.shape_cast %4 : vector<2x96x36xf32> to vector<192x36xf32>
    %c0_4 = arith.constant 0 : index
    %c0_5 = arith.constant 0 : index
    %6 = vector.load %arg3[%c0_4, %c0_5] : memref<36x128xf32, #tpu.memory_space<vmem>>, vector<36x128xf32>
    %cst = arith.constant dense<0.000000e+00> : vector<192x128xf32>
    %7 = tpu.matmul %5, %6, %cst {dimension_numbers = #tpu.dot_dimension_numbers<[1], [0], [0], [1], [0, 0, 1, 1], [], []>} : vector<192x36xf32>, vector<36x128xf32>, vector<192x128xf32> -> vector<192x128xf32>
    %c0_6 = arith.constant 0 : index
    %c0_7 = arith.constant 0 : index
    %8 = vector.load %arg4[%c0_6, %c0_7] : memref<1x128xf32, #tpu.memory_space<vmem>>, vector<1x128xf32>
    %9 = vector.broadcast %8 : vector<1x128xf32> to vector<192x128xf32>
    %10 = arith.addf %7, %9 : vector<192x128xf32>
    %cst_8 = arith.constant 9.99999997E-7 : f32
    %11 = vector.broadcast %cst_8 : f32 to vector<192x128xf32>
    %12 = arith.maximumf %10, %11 : vector<192x128xf32>
    %13 = arith.mulf %12, %12 : vector<192x128xf32>
    %14 = arith.mulf %13, %12 : vector<192x128xf32>
    %15 = vector.shape_cast %14 : vector<192x128xf32> to vector<2x96x128xf32>
    %16 = tpu.iota {dimensions = array<i32: 1>} : vector<2x96x128xi32>
    %c96_i32 = arith.constant 96 : i32
    %17 = arith.muli %arg1, %c96_i32 : i32
    %18 = vector.broadcast %17 : i32 to vector<2x96x128xi32>
    %19 = arith.addi %16, %18 : vector<2x96x128xi32>
    %c256_i32 = arith.constant 256 : i32
    %20 = vector.broadcast %c256_i32 : i32 to vector<2x96x128xi32>
    %21 = arith.cmpi slt, %19, %20 : vector<2x96x128xi32>
    %cst_9 = arith.constant 0.000000e+00 : f32
    %22 = vector.broadcast %cst_9 : f32 to vector<2x96x128xf32>
    %23 = arith.select %21, %15, %22 : vector<2x96x128xi1>, vector<2x96x128xf32>
    %c0_10 = arith.constant 0 : index
    %c0_11 = arith.constant 0 : index
    %24 = vector.load %arg6[%c0_10, %c0_11] : memref<2x128xf32, #tpu.memory_space<vmem>>, vector<2x128xf32>
    %cst_12 = arith.constant dense<0.000000e+00> : vector<2x128xf32>
    %25 = vector.multi_reduction <add>, %23, %cst_12 [1] : vector<2x96x128xf32> to vector<2x128xf32>
    %26 = arith.addf %24, %25 : vector<2x128xf32>
    %c0_13 = arith.constant 0 : index
    %c0_14 = arith.constant 0 : index
    %27 = vector.load %arg6[%c0_13, %c0_14] : memref<2x128xf32, #tpu.memory_space<vmem>>, vector<2x128xf32>
    tpu.vector_store %arg6[%c0_13, %c0_14], %26 {strides = array<i32>} : memref<2x128xf32, #tpu.memory_space<vmem>>, vector<2x128xf32>,
    %c2_i32 = arith.constant 2 : i32
    %28 = arith.cmpi eq, %arg1, %c2_i32 : i32
    %29 = arith.extui %28 : i1 to i32
    %c0_i32_15 = arith.constant 0 : i32
    %30 = arith.cmpi ne, %29, %c0_i32_15 : i32
    scf.if %30 {
      %c0_16 = arith.constant 0 : index
      %c0_17 = arith.constant 0 : index
      %31 = vector.load %arg6[%c0_16, %c0_17] : memref<2x128xf32, #tpu.memory_space<vmem>>, vector<2x128xf32>
      %cst_18 = arith.constant 3.906250e-03 : f32
      %32 = vector.broadcast %cst_18 : f32 to vector<2x128xf32>
      %33 = arith.mulf %31, %32 : vector<2x128xf32>
      %cst_19 = arith.constant 0.333333343 : f32
      %34 = vector.broadcast %cst_19 : f32 to vector<2x128xf32>
      %35 = math.powf %33, %34 : vector<2x128xf32>
      %36 = tpu.iota {dimensions = array<i32: 1>} : vector<2x128xi32>
      %c32_i32 = arith.constant 32 : i32
      %37 = vector.broadcast %c32_i32 : i32 to vector<2x128xi32>
      %38 = arith.cmpi slt, %36, %37 : vector<2x128xi32>
      %cst_20 = arith.constant 0.000000e+00 : f32
      %39 = vector.broadcast %cst_20 : f32 to vector<2x128xf32>
      %40 = arith.select %38, %35, %39 : vector<2x128xi1>, vector<2x128xf32>
      %41 = arith.mulf %40, %40 : vector<2x128xf32>
      %cst_21 = arith.constant dense<0.000000e+00> : vector<2xf32>
      %42 = vector.multi_reduction <add>, %41, %cst_21 [1] : vector<2x128xf32> to vector<2xf32>
      %43 = vector.shape_cast %42 : vector<2xf32> to vector<2x1xf32>
      %44 = math.sqrt %43 : vector<2x1xf32>
      %cst_22 = arith.constant 9.99999997E-7 : f32
      %45 = vector.broadcast %cst_22 : f32 to vector<2x1xf32>
      %46 = arith.addf %44, %45 : vector<2x1xf32>
      %47 = tpu.reciprocal %46 {approx = true} : vector<2x1xf32> -> vector<2x1xf32>
      %48 = arith.mulf %46, %47 : vector<2x1xf32>
      %cst_23 = arith.constant 2.000000e+00 : f32
      %49 = vector.broadcast %cst_23 : f32 to vector<2x1xf32>
      %50 = arith.subf %49, %48 : vector<2x1xf32>
      %51 = arith.mulf %47, %50 : vector<2x1xf32>
      %52 = vector.broadcast %51 : vector<2x1xf32> to vector<2x128xf32>
      %53 = arith.mulf %40, %52 : vector<2x128xf32>
      %c0_24 = arith.constant 0 : index
      %c0_25 = arith.constant 0 : index
      %c0_26 = arith.constant 0 : index
      %54 = vector.load %arg5[%c0_24, %c0_25, %c0_26] : memref<1x2x128xf32, #tpu.memory_space<vmem>>, vector<1x2x128xf32>
      %55 = vector.shape_cast %54 : vector<1x2x128xf32> to vector<2x128xf32>
      %56 = vector.shape_cast %53 : vector<2x128xf32> to vector<1x2x128xf32>
      tpu.vector_store %arg5[%c0_24, %c0_25, %c0_26], %56 {strides = array<i32>} : memref<1x2x128xf32, #tpu.memory_space<vmem>>, vector<1x2x128xf32>,
    } else {
    }
    return
  }
  func.func @transform_0(%arg0: i32, %arg1: i32) -> (i32, i32, i32, i32) {
    %c0_i32 = arith.constant 0 : i32
    %c0_i32_0 = arith.constant 0 : i32
    %c0_i32_1 = arith.constant 0 : i32
    return %arg0, %c0_i32, %arg1, %c0_i32_0 : i32, i32, i32, i32
  }
  func.func @transform_1(%arg0: i32, %arg1: i32) -> (i32, i32) {
    %c0_i32 = arith.constant 0 : i32
    %c0_i32_0 = arith.constant 0 : i32
    %c0_i32_1 = arith.constant 0 : i32
    return %c0_i32, %c0_i32_0 : i32, i32
  }
  func.func @transform_2(%arg0: i32, %arg1: i32) -> (i32, i32) {
    %c0_i32 = arith.constant 0 : i32
    %c0_i32_0 = arith.constant 0 : i32
    %c0_i32_1 = arith.constant 0 : i32
    return %c0_i32, %c0_i32_0 : i32, i32
  }
  func.func @transform_3(%arg0: i32, %arg1: i32) -> (i32, i32, i32) {
    %c0_i32 = arith.constant 0 : i32
    %c0_i32_0 = arith.constant 0 : i32
    %c0_i32_1 = arith.constant 0 : i32
    return %arg0, %c0_i32, %c0_i32_0 : i32, i32, i32
  }
}

module attributes {stable_mosaic.version = 11 : i64} {
  func.func @_whiten_kernel(%arg0: i32, %arg1: memref<8x128xf32, #tpu.memory_space<vmem>>, %arg2: memref<128x128xf32, #tpu.memory_space<vmem>>, %arg3: memref<1x128xf32, #tpu.memory_space<vmem>>, %arg4: memref<8x128xf32, #tpu.memory_space<vmem>>) attributes {dimension_semantics = [#tpu.dimension_semantics<parallel>], iteration_bounds = array<i64: 1>, scalar_prefetch = 0 : i64, scratch_operands = 0 : i64, tpu.core_type = #tpu.core_type<tc>, window_params = [{transform_indices = @transform_0, window_bounds = array<i64: 8, 128>}, {pipeline_mode = #tpu.pipeline_mode<synchronous>, transform_indices = @transform_1, window_bounds = array<i64: 128, 128>}, {pipeline_mode = #tpu.pipeline_mode<synchronous>, transform_indices = @transform_2, window_bounds = array<i64: 1, 128>}, {transform_indices = @transform_3, window_bounds = array<i64: 8, 128>}]} {
    %c0 = arith.constant 0 : index
    %c0_0 = arith.constant 0 : index
    %0 = vector.load %arg1[%c0, %c0_0] : memref<8x128xf32, #tpu.memory_space<vmem>>, vector<8x128xf32>
    %c0_1 = arith.constant 0 : index
    %c0_2 = arith.constant 0 : index
    %1 = vector.load %arg2[%c0_1, %c0_2] : memref<128x128xf32, #tpu.memory_space<vmem>>, vector<128x128xf32>
    %cst = arith.constant dense<0.000000e+00> : vector<8x128xf32>
    %2 = tpu.matmul %0, %1, %cst {dimension_numbers = #tpu.dot_dimension_numbers<[1], [0], [0], [1], [0, 0, 1, 1], [], []>} : vector<8x128xf32>, vector<128x128xf32>, vector<8x128xf32> -> vector<8x128xf32>
    %c0_3 = arith.constant 0 : index
    %c0_4 = arith.constant 0 : index
    %3 = vector.load %arg3[%c0_3, %c0_4] : memref<1x128xf32, #tpu.memory_space<vmem>>, vector<1x128xf32>
    %4 = vector.broadcast %3 : vector<1x128xf32> to vector<8x128xf32>
    %5 = arith.addf %2, %4 : vector<8x128xf32>
    %6 = arith.mulf %5, %5 : vector<8x128xf32>
    %cst_5 = arith.constant dense<0.000000e+00> : vector<8xf32>
    %7 = vector.multi_reduction <add>, %6, %cst_5 [1] : vector<8x128xf32> to vector<8xf32>
    %8 = vector.shape_cast %7 : vector<8xf32> to vector<8x1xf32>
    %9 = math.sqrt %8 : vector<8x1xf32>
    %cst_6 = arith.constant 9.99999997E-7 : f32
    %10 = vector.broadcast %cst_6 : f32 to vector<8x1xf32>
    %11 = arith.addf %9, %10 : vector<8x1xf32>
    %12 = tpu.reciprocal %11 {approx = true} : vector<8x1xf32> -> vector<8x1xf32>
    %13 = arith.mulf %11, %12 : vector<8x1xf32>
    %cst_7 = arith.constant 2.000000e+00 : f32
    %14 = vector.broadcast %cst_7 : f32 to vector<8x1xf32>
    %15 = arith.subf %14, %13 : vector<8x1xf32>
    %16 = arith.mulf %12, %15 : vector<8x1xf32>
    %17 = vector.broadcast %16 : vector<8x1xf32> to vector<8x128xf32>
    %18 = arith.mulf %5, %17 : vector<8x128xf32>
    %c0_8 = arith.constant 0 : index
    %c0_9 = arith.constant 0 : index
    %19 = vector.load %arg4[%c0_8, %c0_9] : memref<8x128xf32, #tpu.memory_space<vmem>>, vector<8x128xf32>
    tpu.vector_store %arg4[%c0_8, %c0_9], %18 {strides = array<i32>} : memref<8x128xf32, #tpu.memory_space<vmem>>, vector<8x128xf32>,
    return
  }
  func.func @transform_0(%arg0: i32) -> (i32, i32) {
    %c0_i32 = arith.constant 0 : i32
    %c0_i32_0 = arith.constant 0 : i32
    return %arg0, %c0_i32 : i32, i32
  }
  func.func @transform_1(%arg0: i32) -> (i32, i32) {
    %c0_i32 = arith.constant 0 : i32
    %c0_i32_0 = arith.constant 0 : i32
    %c0_i32_1 = arith.constant 0 : i32
    return %c0_i32, %c0_i32_0 : i32, i32
  }
  func.func @transform_2(%arg0: i32) -> (i32, i32) {
    %c0_i32 = arith.constant 0 : i32
    %c0_i32_0 = arith.constant 0 : i32
    %c0_i32_1 = arith.constant 0 : i32
    return %c0_i32, %c0_i32_0 : i32, i32
  }
  func.func @transform_3(%arg0: i32) -> (i32, i32) {
    %c0_i32 = arith.constant 0 : i32
    %c0_i32_0 = arith.constant 0 : i32
    return %arg0, %c0_i32 : i32, i32
  }
}

</mosaic_0001>

<bundles_post_ra>
// kernel: image_retrieval_net.3
= control target key start
LH: loop header
LB: loop body
LE: loop exit
PB: predicated region body
PF: predicated region fallthrough
CT: control target
= control target key end

     0   :  { %v213_v0 = vmov 0.0|0.0   ;;  %vm214_vm0 = vmmov 0   ;;  %v215_v4 = vmov 0.0   ;;  %s293_s1 = inlined_call_operand.vmem [shape: f32[128,128], index: 1, kind: input, shape index: {}]   ;;  %s294_s0 = inlined_call_operand.vmem [shape: f32[8,128], index: 0, kind: input, shape index: {}]   ;;  %s295_s2 = inlined_call_operand.vmem [shape: f32[1,128], index: 2, kind: input, shape index: {}]   ;;  %s296_s3 = inlined_call_operand.vmem [shape: f32[8,128], index: 3, kind: output, shape index: {}]  }
   0x1   :  { %182 = vmatprep.subr.bf16.mxu0 %v213_v0  ;;  %v15_v1 = vld [vmem:[%s293_s1] sm:$0xff]  ;;  %v16_v2 = vld [vmem:[%s293_s1 + $0x8] sm:$0xff]  ;;  %v17_v3 = vld [vmem:[%s293_s1 + $0x10] sm:$0xff]  ;;  %179 = vmatprep.mubr.msk.f32.mxu0 %vm214_vm0, %v215_v4 }
   0x2   :  { %v183_v5 = vpack.c.bf16 %v16_v2, %v15_v1  ;;  %v18_v6 = vld [vmem:[%s293_s1 + $0x18] sm:$0xff]  ;;  %v19_v8 = vld [vmem:[%s293_s1 + $0x20] sm:$0xff]  ;;  %v20_v9 = vld [vmem:[%s293_s1 + $0x28] sm:$0xff] }
   0x3   :  { %v186_v7 = vpack.c.bf16 %v18_v6, %v17_v3  ;;  %v189_v10 = vpack.c.bf16 %v20_v9, %v19_v8  ;;  %v21_v11 = vld [vmem:[%s293_s1 + $0x30] sm:$0xff]  ;;  %v22_v12 = vld [vmem:[%s293_s1 + $0x38] sm:$0xff]  ;;  %v23_v14 = vld [vmem:[%s293_s1 + $0x40] sm:$0xff] }
   0x4   :  { %184 = vmatpush3.bf16.msra.mxu0 %v183_v5  ;;  %v192_v13 = vpack.c.bf16 %v22_v12, %v21_v11  ;;  %v24_v15 = vld [vmem:[%s293_s1 + $0x48] sm:$0xff]  ;;  %v25_v17 = vld [vmem:[%s293_s1 + $0x50] sm:$0xff]  ;;  %v26_v18 = vld [vmem:[%s293_s1 + $0x58] sm:$0xff] }
   0x5   :  { %185 = vmatprep.subr.bf16.mxu0 %v213_v0  ;;  %v195_v16 = vpack.c.bf16 %v24_v15, %v23_v14  ;;  %v198_v19 = vpack.c.bf16 %v26_v18, %v25_v17  ;;  %v27_v20 = vld [vmem:[%s293_s1 + $0x60] sm:$0xff]  ;;  %v28_v21 = vld [vmem:[%s293_s1 + $0x68] sm:$0xff]  ;;  %v29_v23 = vld [vmem:[%s293_s1 + $0x70] sm:$0xff] }
   0x6   :  { %v201_v22 = vpack.c.bf16 %v28_v21, %v27_v20  ;;  %v30_v24 = vld [vmem:[%s293_s1 + $0x78] sm:$0xff]  ;;  %v14_v26 = vld [vmem:[%s294_s0] sm:$0xff] }
   0x7   :  { %v204_v25 = vpack.c.bf16 %v30_v24, %v29_v23  ;;  %v129_v27 = vld [vmem:[%s295_s2] ss:$0 sm:$0xff] }
   0x8   :  { %187 = vmatpush3.bf16.msra.mxu0 %v186_v7 }
   0x9   :  { %188 = vmatprep.subr.bf16.mxu0 %v213_v0 }
   0xc   :  { %190 = vmatpush3.bf16.msra.mxu0 %v189_v10 }
   0xd   :  { %191 = vmatprep.subr.bf16.mxu0 %v213_v0 }
  0x10   :  { %193 = vmatpush3.bf16.msra.mxu0 %v192_v13 }
  0x11   :  { %194 = vmatprep.subr.bf16.mxu0 %v213_v0 }
  0x14   :  { %196 = vmatpush3.bf16.msra.mxu0 %v195_v16 }
  0x15   :  { %197 = vmatprep.subr.bf16.mxu0 %v213_v0 }
  0x18   :  { %199 = vmatpush3.bf16.msra.mxu0 %v198_v19 }
  0x19   :  { %200 = vmatprep.subr.bf16.mxu0 %v213_v0 }
  0x1c   :  { %202 = vmatpush3.bf16.msra.mxu0 %v201_v22 }
  0x1d   :  { %203 = vmatprep.subr.bf16.mxu0 %v213_v0 }
  0x20   :  { %205 = vmatpush3.bf16.msra.mxu0 %v204_v25 }
  0x23   :  { %180 = vmatmul.mubr.f32.vlgmr.msra.gmra.mrb[0].mxu0 %v14_v26 }
  0xf6   :  { %v104_v28 = vpop.f32.mrb[0].mxu0 }
  0xf7   :  { %v105_v29 = vadd.f32 %v129_v27, %v104_v28  ;;  %v181_v30 = vpop.f32.mrb[1].mxu0 }
  0xf9   :  { %v108_v31 = vmul.f32 %v105_v29, %v105_v29 }
  0xfb   :  { %109 = vadd.xlane.f32.xlu0 %v108_v31 }
 0x188   :  { %v110_v32 = vpop.xlane.xlu0 %109 }
 0x189   :  { %209 = vrsqrt.f32 %v110_v32  ;;  %vm113_vm1 = vcmp.eq.f32.partialorder %v110_v32, inf  ;;  %v116_v35 = vand.u32 2147483648, %v110_v32  ;;  %vm115_vm2 = vcmp.eq.f32.partialorder %v110_v32, 0.0 }
 0x193   :  { %v210_v33 = vpop.eup %209 }
 0x194   :  { %v112_v34 = vmul.f32 %v210_v33, %v110_v32 }
 0x196   :  { %v114_v36 = vsel %vm113_vm1, %v110_v32, %v112_v34 }
 0x197   :  { %v117_v37 = vsel %vm115_vm2, %v116_v35, %v114_v36 }
 0x198   :  { %v118_v38 = vadd.f32 1e-06, %v117_v37 }
 0x19a   :  { %211 = vrcp.f32 %v118_v38 }
 0x1a4   :  { %v212_v39 = vpop.eup %211 }
 0x1a5   :  { %v120_v40 = vmul.f32 %v212_v39, %v118_v38 }
 0x1a7   :  { %v121_v41 = vsub.f32 2.0, %v120_v40 }
 0x1a9   :  { %v122_v42 = vmul.f32 %v212_v39, %v121_v41 }
 0x1ab   :  { %v123_v43 = vmul.f32 %v122_v42, %v105_v29 }
 0x1ad   :  { %124 = vst [vmem:[%s296_s3] sm:$0xff] %v123_v43 }

// kernel: image_retrieval_net.2
= control target key start
LH: loop header
LB: loop body
LE: loop exit
PB: predicated region body
PF: predicated region fallthrough
CT: control target
= control target key end

     0   :  { %s1147_s12 = smov 0   ;;  %s1149_s13 = smov 0   ;;  %s1442_s0 = inlined_call_operand.vmem [shape: f32[1,2,288,36], index: 0, kind: input, shape index: {}]   ;;  %s1443_s1 = inlined_call_operand.vmem [shape: f32[36,128], index: 1, kind: input, shape index: {}]   ;;  %s1444_s2 = inlined_call_operand.vmem [shape: f32[1,128], index: 2, kind: input, shape index: {}]   ;;  %s1445_s3 = inlined_call_operand.vmem [shape: f32[1,2,128], index: 3, kind: output, shape index: {}]  }
   0x1   :  { %s1151_s14 = smov 0   ;;  %s1153_s15 = smov 0  }
   0x2   :  { %s1155_s16 = smov 0  }
   0x3 LB: > { %s22_s17 = sadd.s32 1, %s1120_s15  ;;  %p41_p1 = scmp.ne.s32.totalorder %s1112_s13, %s1108_s12  ;;  %s1124_s16 = sphi %s1155_s16, %s13_s16   ;;  %s1120_s15 = sphi %s1153_s15, %s1449_s15   ;;  %s1116_s14 = sphi %s1151_s14, %s1448_s14   ;;  %s1112_s13 = sphi %s1149_s13, %s1447_s13   ;;  %s1108_s12 = sphi %s1147_s12, %s1446_s12  }
   0x4   : > { %p23_p0 = scmp.ge.s32.totalorder %s22_s17, 3  ;;  %p42_p2 = scmp.eq.s32.totalorder %s1124_s16, 0 }
   0x5   : > { %s34_s19 = sadd.s32 1, %s1112_s13  ;;  %p893_p5 = scmp.ge.s32.totalorder %s1124_s16, 3 }
   0x6   : > { %s1451_s17 = smov (%p23_p0, %s22_s17), 0  ;;  %p43_p3 = por %p42_p2, %p41_p1 }
   0x7   : > { %s30_s18 = ssub.s32 %s1120_s15, %s1451_s17  ;;  %141 = sbr.rel (%p893_p5) target bundleno = 31 (0x1f), region = 24 }
   0x8   : > { %p32_p4 = scmp.eq.s32.totalorder %s30_s18, 0 }
   0xa   : > { %s1182_s20 = scalar_select %p32_p4, %s1112_s13, %s34_s19  }
   0xe   : > { %144 = sbr.rel (!%p43_p3) target bundleno = 31 (0x1f), region = 28  ;;  %s146_s21 = sand.u32 (%p43_p3), 1, %s1112_s13  }
   0xf   : > { %s927_s22 = smul.u32 (%p43_p3), 96, %s1120_s15 }
  0x10   : > { %s1017_s23 = smul.u32 (%p43_p3), 192, %s146_s21 }
  0x11   : > { %s1190_s26 = scalar_lea.vmem (%p43_p3), %s1442_s0, %s927_s22 }
  0x12   : > { %v227_v0 = vld [vmem:[%s1190_s26] sm:$0xff] (%p43_p3)  ;;  %v229_v1 = vld [vmem:[%s1190_s26 + $0x8] sm:$0xff] (%p43_p3)  ;;  %v231_v2 = vld [vmem:[%s1190_s26 + $0x10] sm:$0xff] (%p43_p3)  ;;  %s1195_s27 = scalar_lea.vmem (%p43_p3), [#allocation3], %s1017_s23 }
  0x13   : > { %228 = vst [vmem:[%s1195_s27] sm:$0xff] (%p43_p3), %v227_v0  ;;  %230 = vst [vmem:[%s1195_s27 + $0x8] sm:$0xff] (%p43_p3), %v229_v1  ;;  %v233_v3 = vld [vmem:[%s1190_s26 + $0x18] sm:$0xff] (%p43_p3)  ;;  %v235_v4 = vld [vmem:[%s1190_s26 + $0x20] sm:$0xff] (%p43_p3) }
  0x14   : > { %232 = vst [vmem:[%s1195_s27 + $0x10] sm:$0xff] (%p43_p3), %v231_v2  ;;  %v237_v5 = vld [vmem:[%s1190_s26 + $0x28] sm:$0xff] (%p43_p3)  ;;  %234 = vst [vmem:[%s1195_s27 + $0x18] sm:$0xff] (%p43_p3), %v233_v3  ;;  %v239_v6 = vld [vmem:[%s1190_s26 + $0x30] sm:$0xff] (%p43_p3) }
  0x15   : > { %236 = vst [vmem:[%s1195_s27 + $0x20] sm:$0xff] %v235_v4  ;;  %238 = vst [vmem:[%s1195_s27 + $0x28] sm:$0xff] %v237_v5  ;;  %v241_v7 = vld [vmem:[%s1190_s26 + $0x38] sm:$0xff]  ;;  %v243_v8 = vld [vmem:[%s1190_s26 + $0x40] sm:$0xff] }
  0x16   : > { %240 = vst [vmem:[%s1195_s27 + $0x30] sm:$0xff] %v239_v6  ;;  %242 = vst [vmem:[%s1195_s27 + $0x38] sm:$0xff] %v241_v7  ;;  %v245_v9 = vld [vmem:[%s1190_s26 + $0x48] sm:$0xff]  ;;  %v247_v10 = vld [vmem:[%s1190_s26 + $0x50] sm:$0xff] }
  0x17   : > { %244 = vst [vmem:[%s1195_s27 + $0x40] sm:$0xff] %v243_v8  ;;  %v249_v11 = vld [vmem:[%s1190_s26 + $0x58] sm:$0xff]  ;;  %246 = vst [vmem:[%s1195_s27 + $0x48] sm:$0xff] %v245_v9  ;;  %v251_v12 = vld [vmem:[%s1190_s26 + $0x120] sm:$0xff] }
  0x18   : > { %248 = vst [vmem:[%s1195_s27 + $0x50] sm:$0xff] %v247_v10  ;;  %250 = vst [vmem:[%s1195_s27 + $0x58] sm:$0xff] %v249_v11  ;;  %v253_v13 = vld [vmem:[%s1190_s26 + $0x128] sm:$0xff]  ;;  %v255_v14 = vld [vmem:[%s1190_s26 + $0x130] sm:$0xff] }
  0x19   : > { %252 = vst [vmem:[%s1195_s27 + $0x60] sm:$0xff] %v251_v12  ;;  %254 = vst [vmem:[%s1195_s27 + $0x68] sm:$0xff] %v253_v13  ;;  %v257_v15 = vld [vmem:[%s1190_s26 + $0x138] sm:$0xff]  ;;  %v259_v16 = vld [vmem:[%s1190_s26 + $0x140] sm:$0xff] }
  0x1a   : > { %256 = vst [vmem:[%s1195_s27 + $0x70] sm:$0xff] %v255_v14  ;;  %v261_v17 = vld [vmem:[%s1190_s26 + $0x148] sm:$0xff]  ;;  %258 = vst [vmem:[%s1195_s27 + $0x78] sm:$0xff] %v257_v15  ;;  %v263_v18 = vld [vmem:[%s1190_s26 + $0x150] sm:$0xff] }
  0x1b   : > { %260 = vst [vmem:[%s1195_s27 + $0x80] sm:$0xff] %v259_v16  ;;  %262 = vst [vmem:[%s1195_s27 + $0x88] sm:$0xff] %v261_v17  ;;  %v265_v19 = vld [vmem:[%s1190_s26 + $0x158] sm:$0xff]  ;;  %v267_v20 = vld [vmem:[%s1190_s26 + $0x160] sm:$0xff] }
  0x1c   : > { %264 = vst [vmem:[%s1195_s27 + $0x90] sm:$0xff] %v263_v18  ;;  %266 = vst [vmem:[%s1195_s27 + $0x98] sm:$0xff] %v265_v19  ;;  %v269_v21 = vld [vmem:[%s1190_s26 + $0x168] sm:$0xff]  ;;  %v271_v22 = vld [vmem:[%s1190_s26 + $0x170] sm:$0xff] }
  0x1d   : > { %268 = vst [vmem:[%s1195_s27 + $0xa0] sm:$0xff] %v267_v20  ;;  %v273_v23 = vld [vmem:[%s1190_s26 + $0x178] sm:$0xff]  ;;  %270 = vst [vmem:[%s1195_s27 + $0xa8] sm:$0xff] %v269_v21 }
  0x1e   : > { %272 = vst [vmem:[%s1195_s27 + $0xb0] sm:$0xff] %v271_v22  ;;  %274 = vst [vmem:[%s1195_s27 + $0xb8] sm:$0xff] %v273_v23 }
  0x1f PF: > { %p895_p6 = scmp.ge.s32.totalorder %s1124_s16, 1  ;;  %p279_p7 = scmp.lt.s32.totalorder %s1124_s16, 4 }
  0x21   : > { %p280_p8 = pnand %p895_p6, %p279_p7 }
  0x22   : > { %s286_s28 = sand.u32 (!%p280_p8), 1, %s1108_s12   ;;  %p896_p9 = scmp.ne.s32.totalorder (!%p280_p8), %s1116_s14, 0 }
  0x23   : > { %283 = sbr.rel (%p280_p8) target bundleno = 559 (0x22f), region = 66 }
  0x24   : > { %s1018_s29 = smul.u32 (!%p280_p8), 192, %s286_s28 }
  0x26   : > { %s1245_s30 = scalar_lea.vmem (!%p280_p8), [#allocation3], %s1018_s29 }
  0x2a   : > { %316 = sbr.rel (%p896_p9) target bundleno = 49 (0x31), region = 74  ;;  %v1126_v24 = vmov (!%p896_p9), 0.0  }
  0x2b   : > { %317 = vst [vmem:[#allocation2] sm:$0x3] (!%p896_p9), %v1126_v24 }
  0x31 PF: > { %v342_v25 = vld [vmem:[%s1443_s1] sm:$0xff]  ;;  %v343_v26 = vld [vmem:[%s1443_s1 + $0x8] sm:$0xff]  ;;  %v344_v27 = vld [vmem:[%s1443_s1 + $0x10] sm:$0xff]  ;;  %vm354_vm0 = vcmask 293888   ;;  %vm427_vm1 = vcmask 1043456   ;;  %v688_v56 = vlaneseq  ;;  %s701_s19 = smul.u32 96, %s1116_s14 }
  0x32   : > { %v1003_v28 = vpack.c.bf16 %v343_v26, %v342_v25  ;;  %v345_v29 = vld [vmem:[%s1443_s1 + $0x18] sm:$0xff]  ;;  %v318_v30 = vld [vmem:[%s1245_s30] sm:$0xff]  ;;  %v319_v34 = vld [vmem:[%s1245_s30 + $0x8] sm:$0xff]  ;;  %vm788_vm14 = vcmask 1041409   ;;  %p923_p10 = scmp.ne.s32.totalorder %s1116_s14, 2 }
  0x33   : > { %v1007_v31 = vpack.c.bf16 %v345_v29, %v344_v27  ;;  %967 = vmatprep.mubr.msk.f32.mxu0 %vm354_vm0, %v318_v30  ;;  %v330_v32 = vld [vmem:[%s1245_s30 + $0x60] sm:$0xff]  ;;  %v331_v35 = vld [vmem:[%s1245_s30 + $0x68] sm:$0xff]  ;;  %v320_v36 = vld [vmem:[%s1245_s30 + $0x10] sm:$0xff]  ;;  %v1312_v57 = vshrl.u32 %v688_v56, 7  ;;  %v1316_v59 = vstv %s701_s19 }
  0x34   : > { %1004 = vmatprep.subr.bf16.mxu0 %v1003_v28  ;;  %1011 = vmatprep.subr.bf16.mxu1 %v1003_v28  ;;  %v346_v33 = vld [vmem:[%s1443_s1 + $0x20] sm:$0xf]  ;;  %v332_v37 = vld [vmem:[%s1245_s30 + $0x70] sm:$0xff]  ;;  %v323_v42 = vld [vmem:[%s1245_s30 + $0x28] sm:$0xff] }
  0x35   : > { %1006 = vmatpush3.bf16.msra.mxu0 %v1003_v28  ;;  %1014 = vmatpush3.bf16.msra.mxu1 %v1003_v28  ;;  %v321_v38 = vld [vmem:[%s1245_s30 + $0x18] sm:$0xff]  ;;  %v322_v40 = vld [vmem:[%s1245_s30 + $0x20] sm:$0xff]  ;;  %v335_v43 = vld [vmem:[%s1245_s30 + $0x88] sm:$0xff]  ;;  %v690_v58 = vadd.s32 8, %v1312_v57  ;;  %v692_v60 = vadd.s32 24, %v1312_v57  ;;  %v691_v61 = vadd.s32 16, %v1312_v57  ;;  %v703_v63 = vadd.s32 %v1316_v59, %v1312_v57 }
  0x36   : > { %1008 = vmatprep.subr.bf16.mxu0 %v1007_v31  ;;  %1012 = vmatprep.subr.bf16.mxu1 %v1007_v31  ;;  %v333_v39 = vld [vmem:[%s1245_s30 + $0x78] sm:$0xff]  ;;  %v334_v41 = vld [vmem:[%s1245_s30 + $0x80] sm:$0xff]  ;;  %v324_v44 = vld [vmem:[%s1245_s30 + $0x30] sm:$0xff]  ;;  %v694_v2 = vadd.s32 40, %v1312_v57  ;;  %v693_v3 = vadd.s32 32, %v1312_v57  ;;  %v696_v5 = vadd.s32 56, %v1312_v57 }
  0x37   : > { %985 = vmatprep.mubr.msk.f32.mxu1 %vm354_vm0, %v330_v32  ;;  %v336_v45 = vld [vmem:[%s1245_s30 + $0x90] sm:$0xff]  ;;  %v325_v46 = vld [vmem:[%s1245_s30 + $0x38] sm:$0xff]  ;;  %v326_v48 = vld [vmem:[%s1245_s30 + $0x40] sm:$0xff]  ;;  %v704_v62 = vadd.s32 %v1316_v59, %v690_v58  ;;  %v1329_v1 = vadd.s32 %v1316_v59, %v692_v60  ;;  %v1334_v4 = vadd.s32 %v1316_v59, %v691_v61  ;;  %v695_v8 = vadd.s32 48, %v1312_v57 }
  0x38   : > { %v337_v47 = vld [vmem:[%s1245_s30 + $0x98] sm:$0xff]  ;;  %v338_v49 = vld [vmem:[%s1245_s30 + $0xa0] sm:$0xff]  ;;  %v327_v50 = vld [vmem:[%s1245_s30 + $0x48] sm:$0xff]  ;;  %v698_v9 = vadd.s32 72, %v1312_v57  ;;  %vm715_vm3 = vcmp.lt.s32.totalorder %v703_v63, 256  ;;  %v1345_v16 = vadd.s32 %v1316_v59, %v694_v2  ;;  %v1348_v17 = vadd.s32 %v1316_v59, %v693_v3 }
  0x39   : > { %1010 = vmatpush3.bf16.msra.mxu0 %v1007_v31  ;;  %1015 = vmatpush3.bf16.msra.mxu1 %v1007_v31  ;;  %v339_v51 = vld [vmem:[%s1245_s30 + $0xa8] sm:$0xff]  ;;  %v328_v52 = vld [vmem:[%s1245_s30 + $0x50] sm:$0xff]  ;;  %v329_v54 = vld [vmem:[%s1245_s30 + $0x58] sm:$0xff]  ;;  %vm716_vm2 = vcmp.lt.s32.totalorder %v704_v62, 256  ;;  %vm718_vm4 = vcmp.lt.s32.totalorder %v1329_v1, 256  ;;  %vm717_vm5 = vcmp.lt.s32.totalorder %v1334_v4, 256  ;;  %v1352_v20 = vadd.s32 %v1316_v59, %v696_v5 }
  0x3a   : > { %965 = vmatprep.subr.msk.mxu0 %vm427_vm1, %v346_v33  ;;  %1013 = vmatprep.subr.msk.mxu1 %vm427_vm1, %v346_v33  ;;  %v340_v53 = vld [vmem:[%s1245_s30 + $0xb0] sm:$0xff]  ;;  %v341_v55 = vld [vmem:[%s1245_s30 + $0xb8] sm:$0xff]  ;;  %v1355_v21 = vadd.s32 64, %v1312_v57  ;;  %v1358_v26 = vadd.s32 %v1316_v59, %v695_v8  ;;  %v1361_v27 = vadd.s32 %v1316_v59, %v698_v9  ;;  %vm719_vm6 = vcmp.lt.s32.totalorder %v1348_v17, 256 }
  0x3b   : > { %v1326_v0 = vld [vmem:[%s1444_s2] ss:$0 sm:$0xff]  ;;  %vm720_vm7 = vcmp.lt.s32.totalorder %v1345_v16, 256  ;;  %vm722_vm9 = vcmp.lt.s32.totalorder %v1352_v20, 256 }
  0x3c   : > { %vm721_vm8 = vcmp.lt.s32.totalorder %v1358_v26, 256  ;;  %vm724_vm11 = vcmp.lt.s32.totalorder %v1361_v27, 256 }
  0x3d   : > { %966 = vmatpush3.msk.msra.mxu0 %vm427_vm1, %v346_v33  ;;  %1016 = vmatpush3.msk.msra.mxu1 %vm427_vm1, %v346_v33 }
  0x3e   : > { %968 = vmatmul.mubr.msk.f32.vlgmr.msra.gmra.mrb[0].mxu0 %vm354_vm0, %v319_v34  ;;  %986 = vmatmul.mubr.msk.f32.vlgmr.msra.gmra.mrb[0].mxu1 %vm354_vm0, %v331_v35 }
  0x3f   : > { %970 = vmatprep.mubr.msk.f32.mxu0 %vm354_vm0, %v320_v36  ;;  %988 = vmatprep.mubr.msk.f32.mxu1 %vm354_vm0, %v332_v37 }
  0x42   : > { %971 = vmatmul.mubr.msk.f32.gmra.mrb[2].mxu0 %vm354_vm0, %v321_v38  ;;  %989 = vmatmul.mubr.msk.f32.gmra.mrb[2].mxu1 %vm354_vm0, %v333_v39 }
  0x43   : > { %973 = vmatprep.mubr.msk.f32.mxu0 %vm354_vm0, %v322_v40  ;;  %991 = vmatprep.mubr.msk.f32.mxu1 %vm354_vm0, %v334_v41 }
  0x46   : > { %974 = vmatmul.mubr.msk.f32.gmra.mrb[4].mxu0 %vm354_vm0, %v323_v42  ;;  %992 = vmatmul.mubr.msk.f32.gmra.mrb[4].mxu1 %vm354_vm0, %v335_v43 }
  0x47   : > { %976 = vmatprep.mubr.msk.f32.mxu0 %vm354_vm0, %v324_v44  ;;  %994 = vmatprep.mubr.msk.f32.mxu1 %vm354_vm0, %v336_v45 }
  0x4a   : > { %977 = vmatmul.mubr.msk.f32.gmra.mrb[6].mxu0 %vm354_vm0, %v325_v46  ;;  %995 = vmatmul.mubr.msk.f32.gmra.mrb[6].mxu1 %vm354_vm0, %v337_v47 }
  0x4b   : > { %979 = vmatprep.mubr.msk.f32.mxu0 %vm354_vm0, %v326_v48  ;;  %997 = vmatprep.mubr.msk.f32.mxu1 %vm354_vm0, %v338_v49 }
  0x4e   : > { %980 = vmatmul.mubr.msk.f32.gmra.mrb[8].mxu0 %vm354_vm0, %v327_v50  ;;  %998 = vmatmul.mubr.msk.f32.gmra.mrb[8].mxu1 %vm354_vm0, %v339_v51 }
  0x4f   : > { %982 = vmatprep.mubr.msk.f32.mxu0 %vm354_vm0, %v328_v52  ;;  %1000 = vmatprep.mubr.msk.f32.mxu1 %vm354_vm0, %v340_v53 }
  0x52   : > { %983 = vmatmul.mubr.msk.f32.gmra.mrb[10].mxu0 %vm354_vm0, %v329_v54  ;;  %1001 = vmatmul.mubr.msk.f32.gmra.mrb[10].mxu1 %vm354_vm0, %v341_v55 }
 0x111   : > { %v969_v6 = vpop.f32.mrb[0].mxu0  ;;  %v987_v7 = vpop.f32.mrb[0].mxu1 }
 0x112   : > { %v503_v10 = vadd.f32 %v969_v6, %v1326_v0  ;;  %v563_v11 = vadd.f32 %v987_v7, %v1326_v0  ;;  %v497_v12 = vpop.f32.mrb[1].mxu0  ;;  %v557_v13 = vpop.f32.mrb[1].mxu1 }
 0x113   : > { %v498_v14 = vadd.f32 %v1326_v0, %v497_v12  ;;  %v558_v15 = vadd.f32 %v1326_v0, %v557_v13 }
 0x114   : > { %v617_v18 = vmax.f32 %v503_v10, 1e-06  ;;  %v629_v19 = vmax.f32 %v563_v11, 1e-06 }
 0x115   : > { %v616_v22 = vmax.f32 %v498_v14, 1e-06  ;;  %v628_v23 = vmax.f32 %v558_v15, 1e-06  ;;  %v972_v24 = vpop.f32.mrb[2].mxu0  ;;  %v990_v25 = vpop.f32.mrb[2].mxu1 }
 0x116   : > { %v641_v28 = vmul.f32 %v617_v18, %v617_v18  ;;  %v653_v29 = vmul.f32 %v629_v19, %v629_v19  ;;  %v513_v30 = vadd.f32 %v972_v24, %v1326_v0  ;;  %v573_v31 = vadd.f32 %v990_v25, %v1326_v0  ;;  %v507_v32 = vpop.f32.mrb[3].mxu0  ;;  %v567_v33 = vpop.f32.mrb[3].mxu1 }
 0x117   : > { %v640_v34 = vmul.f32 %v616_v22, %v616_v22  ;;  %v652_v35 = vmul.f32 %v628_v23, %v628_v23  ;;  %v508_v36 = vadd.f32 %v1326_v0, %v507_v32  ;;  %v568_v37 = vadd.f32 %v1326_v0, %v567_v33 }
 0x118   : > { %v665_v38 = vmul.f32 %v641_v28, %v617_v18  ;;  %v677_v39 = vmul.f32 %v653_v29, %v629_v19  ;;  %v619_v40 = vmax.f32 %v513_v30, 1e-06  ;;  %v631_v41 = vmax.f32 %v573_v31, 1e-06 }
 0x119   : > { %v664_v42 = vmul.f32 %v640_v34, %v616_v22  ;;  %v676_v43 = vmul.f32 %v652_v35, %v628_v23  ;;  %v618_v44 = vmax.f32 %v508_v36, 1e-06  ;;  %v630_v45 = vmax.f32 %v568_v37, 1e-06  ;;  %v975_v46 = vpop.f32.mrb[4].mxu0  ;;  %v993_v47 = vpop.f32.mrb[4].mxu1 }
 0x11a   : > { %v728_v48 = vsel %vm716_vm2, %v665_v38, 0.0  ;;  %v740_v49 = vsel %vm716_vm2, %v677_v39, 0.0  ;;  %v643_v50 = vmul.f32 %v619_v40, %v619_v40  ;;  %v655_v51 = vmul.f32 %v631_v41, %v631_v41  ;;  %v517_v52 = vpop.f32.mrb[5].mxu0  ;;  %v577_v53 = vpop.f32.mrb[5].mxu1 }
 0x11b   : > { %v727_v54 = vsel %vm715_vm3, %v664_v42, 0.0  ;;  %v739_v55 = vsel %vm715_vm3, %v676_v43, 0.0  ;;  %v642_v58 = vmul.f32 %v618_v44, %v618_v44  ;;  %v654_v60 = vmul.f32 %v630_v45, %v630_v45 }
 0x11c   : > { %v752_v61 = vadd.f32 %v728_v48, %v727_v54  ;;  %v769_v2 = vadd.f32 %v740_v49, %v739_v55  ;;  %v667_v3 = vmul.f32 %v643_v50, %v619_v40  ;;  %v679_v5 = vmul.f32 %v655_v51, %v631_v41 }
 0x11d   : > { %v666_v62 = vmul.f32 %v642_v58, %v618_v44  ;;  %v678_v6 = vmul.f32 %v654_v60, %v630_v45  ;;  %v523_v7 = vadd.f32 %v975_v46, %v1326_v0  ;;  %v583_v8 = vadd.f32 %v993_v47, %v1326_v0  ;;  %v978_v9 = vpop.f32.mrb[6].mxu0  ;;  %v996_v10 = vpop.f32.mrb[6].mxu1 }
 0x11e   : > { %v730_v63 = vsel %vm718_vm4, %v667_v3, 0.0  ;;  %v742_v11 = vsel %vm718_vm4, %v679_v5, 0.0  ;;  %v518_v12 = vadd.f32 %v1326_v0, %v517_v52  ;;  %v578_v13 = vadd.f32 %v1326_v0, %v577_v53  ;;  %v527_v14 = vpop.f32.mrb[7].mxu0  ;;  %v587_v15 = vpop.f32.mrb[7].mxu1 }
 0x11f   : > { %v729_v18 = vsel %vm717_vm5, %v666_v62, 0.0  ;;  %v741_v19 = vsel %vm717_vm5, %v678_v6, 0.0  ;;  %v621_v22 = vmax.f32 %v523_v7, 1e-06  ;;  %v633_v23 = vmax.f32 %v583_v8, 1e-06 }
 0x120   : > { %v753_v24 = vadd.f32 %v752_v61, %v729_v18  ;;  %v770_v25 = vadd.f32 %v769_v2, %v741_v19  ;;  %v620_v28 = vmax.f32 %v518_v12, 1e-06  ;;  %v632_v29 = vmax.f32 %v578_v13, 1e-06 }
 0x121   : > { %v645_v1 = vmul.f32 %v621_v22, %v621_v22  ;;  %v657_v30 = vmul.f32 %v633_v23, %v633_v23  ;;  %v533_v31 = vadd.f32 %v978_v9, %v1326_v0  ;;  %v593_v32 = vadd.f32 %v996_v10, %v1326_v0  ;;  %v981_v33 = vpop.f32.mrb[8].mxu0  ;;  %v999_v34 = vpop.f32.mrb[8].mxu1 }
 0x122   : > { %v644_v35 = vmul.f32 %v620_v28, %v620_v28  ;;  %v754_v36 = vadd.f32 %v753_v24, %v730_v63  ;;  %v656_v4 = vmul.f32 %v632_v29, %v632_v29  ;;  %v771_v37 = vadd.f32 %v770_v25, %v742_v11  ;;  %v537_v38 = vpop.f32.mrb[9].mxu0  ;;  %v597_v39 = vpop.f32.mrb[9].mxu1 }
 0x123   : > { %v669_v40 = vmul.f32 %v645_v1, %v621_v22  ;;  %v681_v41 = vmul.f32 %v657_v30, %v633_v23  ;;  %v623_v42 = vmax.f32 %v533_v31, 1e-06  ;;  %v635_v43 = vmax.f32 %v593_v32, 1e-06 }
 0x124   : > { %v668_v44 = vmul.f32 %v644_v35, %v620_v28  ;;  %v680_v45 = vmul.f32 %v656_v4, %v632_v29  ;;  %v528_v46 = vadd.f32 %v1326_v0, %v527_v14  ;;  %v588_v47 = vadd.f32 %v1326_v0, %v587_v15 }
 0x125   : > { %v647_v48 = vmul.f32 %v623_v42, %v623_v42  ;;  %v659_v49 = vmul.f32 %v635_v43, %v635_v43  ;;  %v711_v50 = vadd.s32 %v1316_v59, %v1355_v21  ;;  %v984_v51 = vpop.f32.mrb[10].mxu0  ;;  %v1002_v52 = vpop.f32.mrb[10].mxu1  ;;  %v699_v53 = vadd.s32 80, %v1312_v57 }
 0x126   : > { %v731_v54 = vsel %vm719_vm6, %v668_v44, 0.0  ;;  %v743_v55 = vsel %vm719_vm6, %v680_v45, 0.0  ;;  %v622_v58 = vmax.f32 %v528_v46, 1e-06  ;;  %v634_v60 = vmax.f32 %v588_v47, 1e-06 }
 0x127   : > { %v732_v61 = vsel %vm720_vm7, %v669_v40, 0.0  ;;  %v744_v2 = vsel %vm720_vm7, %v681_v41, 0.0  ;;  %v755_v3 = vadd.f32 %v754_v36, %v731_v54  ;;  %v772_v21 = vadd.f32 %v771_v37, %v743_v55  ;;  %v547_v5 = vpop.f32.mrb[11].mxu0  ;;  %v607_v62 = vpop.f32.mrb[11].mxu1 }
 0x128   : > { %v646_v6 = vmul.f32 %v622_v58, %v622_v58  ;;  %v658_v7 = vmul.f32 %v634_v60, %v634_v60  ;;  %v543_v8 = vadd.f32 %v981_v33, %v1326_v0  ;;  %v603_v9 = vadd.f32 %v999_v34, %v1326_v0 }
 0x129   : > { %v671_v17 = vmul.f32 %v647_v48, %v623_v42  ;;  %v683_v10 = vmul.f32 %v659_v49, %v635_v43  ;;  %v756_v63 = vadd.f32 %v755_v3, %v732_v61  ;;  %v773_v11 = vadd.f32 %v772_v21, %v744_v2 }
 0x12a   : > { %v670_v12 = vmul.f32 %v646_v6, %v622_v58  ;;  %v682_v13 = vmul.f32 %v658_v7, %v634_v60  ;;  %v625_v14 = vmax.f32 %v543_v8, 1e-06  ;;  %v637_v15 = vmax.f32 %v603_v9, 1e-06 }
 0x12b   : > { %v538_v16 = vadd.f32 %v1326_v0, %v537_v38  ;;  %v598_v18 = vadd.f32 %v1326_v0, %v597_v39  ;;  %v553_v19 = vadd.f32 %v984_v51, %v1326_v0  ;;  %v613_v22 = vadd.f32 %v1002_v52, %v1326_v0 }
 0x12c   : > { %v733_v23 = vsel %vm721_vm8, %v670_v12, 0.0  ;;  %v745_v24 = vsel %vm721_vm8, %v682_v13, 0.0  ;;  %v649_v25 = vmul.f32 %v625_v14, %v625_v14  ;;  %v661_v28 = vmul.f32 %v637_v15, %v637_v15 }
 0x12d   : > { %v757_v29 = vadd.f32 %v756_v63, %v733_v23  ;;  %v774_v1 = vadd.f32 %v773_v11, %v745_v24  ;;  %v624_v30 = vmax.f32 %v538_v16, 1e-06  ;;  %v636_v31 = vmax.f32 %v598_v18, 1e-06 }
 0x12e   : > { %v734_v32 = vsel %vm722_vm9, %v671_v17, 0.0  ;;  %v746_v33 = vsel %vm722_vm9, %v683_v10, 0.0  ;;  %v627_v34 = vmax.f32 %v553_v19, 1e-06  ;;  %v639_v35 = vmax.f32 %v613_v22, 1e-06 }
 0x12f   : > { %v648_v36 = vmul.f32 %v624_v30, %v624_v30  ;;  %v758_v4 = vadd.f32 %v757_v29, %v734_v32  ;;  %v660_v37 = vmul.f32 %v636_v31, %v636_v31  ;;  %v775_v38 = vadd.f32 %v774_v1, %v746_v33  ;;  %v751_v22 = vld [vmem:[#allocation2] sm:$0x3] }
 0x130   : > { %v673_v26 = vmul.f32 %v649_v25, %v625_v14  ;;  %v685_v39 = vmul.f32 %v661_v28, %v637_v15  ;;  %vm723_vm10 = vcmp.lt.s32.totalorder %v711_v50, 256  ;;  %v700_v40 = vadd.s32 88, %v1312_v57 }
 0x131   : > { %v672_v41 = vmul.f32 %v648_v36, %v624_v30  ;;  %v684_v42 = vmul.f32 %v660_v37, %v636_v31  ;;  %v548_v43 = vadd.f32 %v1326_v0, %v547_v5  ;;  %v608_v44 = vadd.f32 %v1326_v0, %v607_v62 }
 0x132   : > { %v651_v20 = vmul.f32 %v627_v34, %v627_v34  ;;  %v663_v45 = vmul.f32 %v639_v35, %v639_v35  ;;  %v713_v46 = vadd.s32 %v1316_v59, %v699_v53  ;;  %v714_v57 = vadd.s32 %v1316_v59, %v700_v40 }
 0x133   : > { %v735_v47 = vsel %vm723_vm10, %v672_v41, 0.0  ;;  %v747_v48 = vsel %vm723_vm10, %v684_v42, 0.0  ;;  %v626_v49 = vmax.f32 %v548_v43, 1e-06  ;;  %v638_v51 = vmax.f32 %v608_v44, 1e-06 }
 0x134   : > { %v759_v52 = vadd.f32 %v758_v4, %v735_v47  ;;  %v776_v50 = vadd.f32 %v775_v38, %v747_v48  ;;  %v736_v54 = vsel %vm724_vm11, %v673_v26, 0.0  ;;  %v748_v55 = vsel %vm724_vm11, %v685_v39, 0.0 }
 0x135   : > { %v650_v58 = vmul.f32 %v626_v49, %v626_v49  ;;  %v662_v60 = vmul.f32 %v638_v51, %v638_v51  ;;  %vm725_vm12 = vcmp.lt.s32.totalorder %v713_v46, 256  ;;  %v675_v27 = vmul.f32 %v651_v20, %v627_v34 }
 0x136   : > { %v760_v0 = vadd.f32 %v759_v52, %v736_v54  ;;  %v777_v61 = vadd.f32 %v776_v50, %v748_v55  ;;  %v687_v2 = vmul.f32 %v663_v45, %v639_v35  ;;  %vm726_vm13 = vcmp.lt.s32.totalorder %v714_v57, 256 }
 0x137   : > { %v674_v3 = vmul.f32 %v650_v58, %v626_v49  ;;  %v686_v21 = vmul.f32 %v662_v60, %v638_v51  ;;  %v738_v7 = vsel %vm726_vm13, %v675_v27, 0.0  ;;  %v801_v35 = vand.u32 (!%p923_p10), 127, %v688_v56 }
 0x138   : > { %v750_v8 = vsel %vm726_vm13, %v687_v2, 0.0  ;;  %vm805_vm5 = vcmask (!%p923_p10), 1041408  }
 0x139   : > { %v737_v53 = vsel %vm725_vm12, %v674_v3, 0.0  ;;  %v749_v5 = vsel %vm725_vm12, %v686_v21, 0.0  ;;  %vm802_vm4 = vcmp.lt.s32.totalorder (!%p923_p10), %v801_v35, 32 }
 0x13a   : > { %v761_v62 = vadd.f32 %v760_v0, %v737_v53  ;;  %v778_v6 = vadd.f32 %v777_v61, %v749_v5 }
 0x13c   : > { %v762_v9 = vadd.f32 %v761_v62, %v738_v7  ;;  %v779_v59 = vadd.f32 %v778_v6, %v750_v8 }
 0x13e   : > { %v763_v17 = vrot.slane %v762_v9, 4  ;;  %v780_v10 = vrot.slane %v779_v59, 4 }
 0x140   : > { %v764_v63 = vadd.f32 %v763_v17, %v762_v9  ;;  %v781_v11 = vadd.f32 %v780_v10, %v779_v59 }
 0x142   : > { %v765_v12 = vrot.slane %v764_v63, 2  ;;  %v782_v13 = vrot.slane %v781_v11, 2 }
 0x144   : > { %v766_v14 = vadd.f32 %v765_v12, %v764_v63  ;;  %v783_v15 = vadd.f32 %v782_v13, %v781_v11 }
 0x146   : > { %v767_v16 = vrot.slane %v766_v14, 1  ;;  %v784_v18 = vrot.slane %v783_v15, 1 }
 0x147   : > { %796 = sbr.rel (%p923_p10) target bundleno = 559 (0x22f), region = 78 }
 0x148   : > { %v768_v19 = vadd.f32 %v767_v16, %v766_v14  ;;  %v785_v23 = vadd.f32 %v784_v18, %v783_v15 }
 0x14a   : > { %v789_v24 = vsel %vm788_vm14, %v785_v23, %v768_v19 }
 0x14b   : > { %v791_v25 = vadd.f32 %v789_v24, %v751_v22 }
 0x14d   : > { %792 = vst [vmem:[#allocation2] sm:$0x3] %v791_v25 }
 0x154   : > { %v797_v28 = vld [vmem:[#allocation2] sm:$0x3] }
 0x155   : > { %v798_v29 = vmul.f32 0.00390625, %v797_v28 }
 0x157   : > { %v1021_v1 = vand.u32 2147483647, %v798_v29  ;;  %v1025_v32 = vand.u32 2147483648, %v798_v29  ;;  %vm1020_vm1 = vcmp.lt.f32.partialorder %v798_v29, 0.0  ;;  %vm1019_vm2 = vcmp.eq.f32.partialorder %v798_v29, 0.0 }
 0x159   : > { %1078 = vlog2.f32 %v1021_v1  ;;  %vm1029_vm15 = vweird.f32 %v1021_v1  ;;  %vm1031_vm0 = vcmp.eq.f32.partialorder %v1021_v1, 0.0  ;;  %vm1022_vm3 = vcmp.eq.f32.partialorder %v1021_v1, inf }
 0x163   : > { %v1079_v30 = vpop.eup %1078 }
 0x164   : > { %v1026_v31 = vmul.f32 0.33333334, %v1079_v30 }
 0x166   : > { %1080 = vpow2.f32 %v1026_v31 }
 0x170   : > { %v1081_v33 = vpop.eup %1080 }
 0x171   : > { %v1028_v34 = vor.u32 %v1081_v33, %v1025_v32 }
 0x173   : > { %v1030_v36 = vsel %vm1029_vm15, %v798_v29, %v1028_v34 }
 0x174   : > { %v1033_v4 = vsel %vm1031_vm0, %v1025_v32, %v1030_v36 }
 0x175   : > { %v1034_v37 = vsel %vm1020_vm1, nan, %v1033_v4 }
 0x176   : > { %v1035_v38 = vsel %vm1019_vm2, 0.0, %v1034_v37 }
 0x177   : > { %v1036_v26 = vsel %vm1022_vm3, inf, %v1035_v38 }
 0x178   : > { %v803_v39 = vsel %vm802_vm4, %v1036_v26, 0.0 }
 0x179   : > { %v804_v40 = vmul.f32 %v803_v39, %v803_v39 }
 0x17b   : > { %v806_v41 = vsel %vm805_vm5, %v804_v40, 0.0 }
 0x17c   : > { %807 = vadd.xlane.f32.xlu0 %v806_v41 }
 0x209   : > { %v808_v42 = vpop.xlane.xlu0 %807 }
 0x20a   : > { %1082 = vrsqrt.f32 %v808_v42  ;;  %vm811_vm6 = vcmp.eq.f32.partialorder %v808_v42, inf  ;;  %v814_v56 = vand.u32 2147483648, %v808_v42  ;;  %vm813_vm7 = vcmp.eq.f32.partialorder %v808_v42, 0.0 }
 0x214   : > { %v1083_v43 = vpop.eup %1082 }
 0x215   : > { %v810_v44 = vmul.f32 %v1083_v43, %v808_v42 }
 0x217   : > { %v812_v20 = vsel %vm811_vm6, %v808_v42, %v810_v44 }
 0x218   : > { %v815_v45 = vsel %vm813_vm7, %v814_v56, %v812_v20 }
 0x219   : > { %v816_v46 = vadd.f32 1e-06, %v815_v45 }
 0x21b   : > { %1084 = vrcp.f32 %v816_v46 }
 0x225   : > { %v1085_v47 = vpop.eup %1084 }
 0x226   : > { %v818_v48 = vmul.f32 %v1085_v47, %v816_v46 }
 0x228   : > { %v819_v49 = vsub.f32 2.0, %v818_v48 }
 0x22a   : > { %v820_v51 = vmul.f32 %v1085_v47, %v819_v49 }
 0x22c   : > { %v821_v52 = vmul.f32 %v820_v51, %v803_v39 }
 0x22e   : > { %822 = vst [vmem:[%s1445_s3] sm:$0x3] %v821_v52 }
 0x22f PF: > { %s13_s16 = sadd.s32 1, %s1124_s16   ;;  %s1446_s12 = smov %s1112_s13 }
 0x230   : > { %p10_p11 = scmp.ge.s32.totalorder %s13_s16, 5   ;;  %s1447_s13 = smov %s1182_s20 }
 0x231   : > { %s1448_s14 = smov %s1120_s15  ;;  %s1449_s15 = smov %s1451_s17 }
 0x232   :  { %12 = sbr.rel (!%p10_p11) target bundleno = 3 (0x3), region = 113 }

</bundles_post_ra>
